<compile_context>
chip_gen: v7x
topology: tpu7x:2x2x1
jax: 0.10.0
libtpu: 0.0.40
codegen_flags: <defaults>
</compile_context>

<pallas_src>
import functools

import jax
import jax.numpy as jnp
from jax.experimental import pallas as pl
from jax.experimental.pallas import tpu as pltpu

_LANE = 128
_MAX_TILE_S = 32768   # lanes per spatial tile (multiple of 128); ~1 MiB per 8-row f32 block
_MAX_BC_TILE = 8      # rows per tile (one f32 sublane group)


def _round_up(v, m):
    return ((v + m - 1) // m) * m


def _loss_reduce_kernel(x_ref, y_ref, out_ref, *, s_total, tile_s, need_mask):
    """Accumulate per-(b,c)-row partial sums over spatial tiles.

    x_ref / y_ref : (BC_TILE, TILE_S) logits / one-hot targets (original dtype).
    out_ref       : (BC_TILE, 4) resident f32 accumulator:
                    [:,0]=intersect  [:,1]=sum_pred  [:,2]=sum_gt  [:,3]=bce_sum
    """
    j = pl.program_id(1)

    @pl.when(j == 0)
    def _():
        out_ref[...] = jnp.zeros_like(out_ref)

    x = x_ref[...].astype(jnp.float32)
    y = y_ref[...].astype(jnp.float32)

    if need_mask:
        # Ragged spatial tail: sanitize out-of-bounds elements in-register.
        # logits -> -100 (sigmoid ~ 0, softplus ~ 0), targets -> 0, so masked
        # elements contribute < 1e-43 each (numerically inert, no inf/nan).
        col = jax.lax.broadcasted_iota(jnp.int32, x.shape, 1)
        in_bounds = (col + j * tile_s) < s_total
        x = jnp.where(in_bounds, x, -100.0)
        y = jnp.where(in_bounds, y, 0.0)

    # Share exp(-|x|) between sigmoid and the numerically stable BCE-with-logits.
    e = jnp.exp(-jnp.abs(x))
    inv = 1.0 / (1.0 + e)
    p = jnp.where(x >= 0.0, inv, e * inv)                 # sigmoid(x)
    bce = jnp.maximum(x, 0.0) - x * y + jnp.log1p(e)      # BCEWithLogits, elementwise

    out_ref[:, 0:1] += jnp.sum(p * y, axis=1, keepdims=True)
    out_ref[:, 1:2] += jnp.sum(p, axis=1, keepdims=True)
    out_ref[:, 2:3] += jnp.sum(y, axis=1, keepdims=True)
    out_ref[:, 3:4] += jnp.sum(bce, axis=1, keepdims=True)


def _reduce_sums(x2d, y2d):
    """x2d, y2d: (BC, S) arrays in their original dtype. Returns (BC, 4) f32 sums."""
    bc, s = x2d.shape

    tile_s = min(_MAX_TILE_S, _round_up(s, _LANE))
    bc_tile = bc if bc <= _MAX_BC_TILE else _MAX_BC_TILE
    grid = (pl.cdiv(bc, bc_tile), pl.cdiv(s, tile_s))
    need_mask = (s % tile_s) != 0

    kernel = functools.partial(
        _loss_reduce_kernel, s_total=s, tile_s=tile_s, need_mask=need_mask)

    in_spec = pl.BlockSpec((bc_tile, tile_s), lambda i, j: (i, j))
    out_spec = pl.BlockSpec((bc_tile, 4), lambda i, j: (i, 0))

    return pl.pallas_call(
        kernel,
        out_shape=jax.ShapeDtypeStruct((bc, 4), jnp.float32),
        grid_spec=pltpu.PrefetchScalarGridSpec(
            num_scalar_prefetch=0,
            grid=grid,
            in_specs=[in_spec, in_spec],
            out_specs=out_spec,
        ),
        compiler_params=pltpu.CompilerParams(
            dimension_semantics=("parallel", "arbitrary"),
        ),
    )(x2d, y2d)


@functools.partial(jax.jit, static_argnames=("weight_ce", "weight_dice", "smooth"))
def dc_and_bce_loss(net_output, target, weight_ce=1.0, weight_dice=1.0, smooth=1.0):
    """DC_and_BCE_loss.forward with use_ignore_label=False.

    net_output: (b, c, *spatial) raw logits (NCHW-like).
    target:     (b, c, *spatial) one-hot regions, same shape as net_output.
    """
    # TODO(synk): use_ignore_label=True branch (mask from target[:, -1]) not implemented.
    b, c = net_output.shape[0], net_output.shape[1]
    x = net_output.reshape(b * c, -1)   # keep original dtype; kernel casts in-register
    y = target.reshape(b * c, -1)
    bc, s = x.shape

    sums = _reduce_sums(x, y)           # (bc, 4) float32
    intersect = sums[:, 0]
    sum_pred = sums[:, 1]
    sum_gt = sums[:, 2]
    bce_sum = sums[:, 3]

    # MemoryEfficientSoftDiceLoss (batch_dice=False, do_bg=True, ddp=False):
    dc = (2.0 * intersect + smooth) / jnp.maximum(sum_gt + sum_pred + smooth, 1e-8)
    dc_loss = -jnp.mean(dc)

    # BCEWithLogitsLoss(reduction='mean') over all original elements:
    ce_loss = jnp.sum(bce_sum) / jnp.float32(bc * s)

    return weight_ce * ce_loss + weight_dice * dc_loss


def _reference_loss(net_output, target, weight_ce=1.0, weight_dice=1.0, smooth=1.0):
    """Pure-JAX reference mirroring the PyTorch module."""
    x = net_output.astype(jnp.float32)
    y = target.astype(jnp.float32)
    p = jax.nn.sigmoid(x)
    axes = tuple(range(2, x.ndim))
    intersect = jnp.sum(p * y, axis=axes)
    sum_pred = jnp.sum(p, axis=axes)
    sum_gt = jnp.sum(y, axis=axes)
    dc = (2.0 * intersect + smooth) / jnp.maximum(sum_gt + sum_pred + smooth, 1e-8)
    dc_loss = -jnp.mean(dc)
    bce = jnp.maximum(x, 0.0) - x * y + jnp.log1p(jnp.exp(-jnp.abs(x)))
    ce_loss = jnp.mean(bce)
    return weight_ce * ce_loss + weight_dice * dc_loss


if __name__ == "__main__":
    key = jax.random.PRNGKey(0)
    k1, k2 = jax.random.split(key)

    b, c, h, w = 2, 4, 16, 16
    net_output = jax.random.normal(k1, (b, c, h, w), dtype=jnp.float32)
    # one-hot region target along the channel axis (same shape as net_output)
    labels = jax.random.randint(k2, (b, h, w), 0, c)
    target = jax.nn.one_hot(labels, c, axis=1, dtype=jnp.float32)  # (b, c, h, w)

    loss = dc_and_bce_loss(net_output, target)
    loss = jax.block_until_ready(loss)

    ref = _reference_loss(net_output, target)
    assert jnp.allclose(loss, ref, rtol=1e-5, atol=1e-5), (loss, ref)

    print("KERNEL_OK")
</pallas_src>

<mosaic_0001>
module attributes {stable_mosaic.version = 11 : i64} {
  func.func @_loss_reduce_kernel(%arg0: i32, %arg1: i32, %arg2: memref<8x256xf32, #tpu.memory_space<vmem>>, %arg3: memref<8x256xf32, #tpu.memory_space<vmem>>, %arg4: memref<8x4xf32, #tpu.memory_space<vmem>>) attributes {dimension_semantics = [#tpu.dimension_semantics<parallel>, #tpu.dimension_semantics<arbitrary>], iteration_bounds = array<i64: 1, 1>, scalar_prefetch = 0 : i64, scratch_operands = 0 : i64, tpu.core_type = #tpu.core_type<tc>, window_params = [{transform_indices = @transform_0, window_bounds = array<i64: 8, 256>}, {transform_indices = @transform_1, window_bounds = array<i64: 8, 256>}, {transform_indices = @transform_2, window_bounds = array<i64: 8, 4>}]} {
    %c0_i32 = arith.constant 0 : i32
    %0 = arith.cmpi eq, %arg1, %c0_i32 : i32
    %1 = arith.extui %0 : i1 to i32
    %c0_i32_0 = arith.constant 0 : i32
    %2 = arith.cmpi ne, %1, %c0_i32_0 : i32
    scf.if %2 {
      %cst_25 = arith.constant 0.000000e+00 : f32
      %44 = vector.broadcast %cst_25 : f32 to vector<8x4xf32>
      %c0_26 = arith.constant 0 : index
      %c0_27 = arith.constant 0 : index
      %45 = vector.load %arg4[%c0_26, %c0_27] : memref<8x4xf32, #tpu.memory_space<vmem>>, vector<8x4xf32>
      tpu.vector_store %arg4[%c0_26, %c0_27], %44 {strides = array<i32>} : memref<8x4xf32, #tpu.memory_space<vmem>>, vector<8x4xf32>,
    } else {
    }
    %c0 = arith.constant 0 : index
    %c0_1 = arith.constant 0 : index
    %3 = vector.load %arg2[%c0, %c0_1] : memref<8x256xf32, #tpu.memory_space<vmem>>, vector<8x256xf32>
    %c0_2 = arith.constant 0 : index
    %c0_3 = arith.constant 0 : index
    %4 = vector.load %arg3[%c0_2, %c0_3] : memref<8x256xf32, #tpu.memory_space<vmem>>, vector<8x256xf32>
    %5 = math.absf %3 : vector<8x256xf32>
    %cst = arith.constant 0.000000e+00 : f32
    %6 = vector.broadcast %cst : f32 to vector<8x256xf32>
    %7 = arith.subf %6, %5 : vector<8x256xf32>
    %8 = math.exp %7 : vector<8x256xf32>
    %cst_4 = arith.constant 1.000000e+00 : f32
    %9 = vector.broadcast %cst_4 : f32 to vector<8x256xf32>
    %10 = arith.addf %9, %8 : vector<8x256xf32>
    %cst_5 = arith.constant 1.000000e+00 : f32
    %11 = vector.broadcast %cst_5 : f32 to vector<8x256xf32>
    %12 = arith.divf %11, %10 : vector<8x256xf32>
    %cst_6 = arith.constant 0.000000e+00 : f32
    %13 = vector.broadcast %cst_6 : f32 to vector<8x256xf32>
    %14 = arith.cmpf oge, %3, %13 : vector<8x256xf32>
    %15 = arith.mulf %8, %12 : vector<8x256xf32>
    %16 = arith.select %14, %12, %15 : vector<8x256xi1>, vector<8x256xf32>
    %cst_7 = arith.constant 0.000000e+00 : f32
    %17 = vector.broadcast %cst_7 : f32 to vector<8x256xf32>
    %18 = arith.maximumf %3, %17 : vector<8x256xf32>
    %19 = arith.mulf %3, %4 : vector<8x256xf32>
    %20 = arith.subf %18, %19 : vector<8x256xf32>
    %21 = math.log1p %8 : vector<8x256xf32>
    %22 = arith.addf %20, %21 : vector<8x256xf32>
    %c0_8 = arith.constant 0 : index
    %c0_9 = arith.constant 0 : index
    %23 = vector.load %arg4[%c0_8, %c0_9] : memref<8x4xf32, #tpu.memory_space<vmem>>, vector<8x1xf32>
    %24 = arith.mulf %16, %4 : vector<8x256xf32>
    %cst_10 = arith.constant dense<0.000000e+00> : vector<8xf32>
    %25 = vector.multi_reduction <add>, %24, %cst_10 [1] : vector<8x256xf32> to vector<8xf32>
    %26 = vector.shape_cast %25 : vector<8xf32> to vector<8x1xf32>
    %27 = arith.addf %23, %26 : vector<8x1xf32>
    %c0_11 = arith.constant 0 : index
    %c0_12 = arith.constant 0 : index
    %28 = vector.load %arg4[%c0_11, %c0_12] : memref<8x4xf32, #tpu.memory_space<vmem>>, vector<8x1xf32>
    tpu.vector_store %arg4[%c0_11, %c0_12], %27 {strides = array<i32>} : memref<8x4xf32, #tpu.memory_space<vmem>>, vector<8x1xf32>,
    %c0_13 = arith.constant 0 : index
    %c1 = arith.constant 1 : index
    %29 = vector.load %arg4[%c0_13, %c1] : memref<8x4xf32, #tpu.memory_space<vmem>>, vector<8x1xf32>
    %cst_14 = arith.constant dense<0.000000e+00> : vector<8xf32>
    %30 = vector.multi_reduction <add>, %16, %cst_14 [1] : vector<8x256xf32> to vector<8xf32>
    %31 = vector.shape_cast %30 : vector<8xf32> to vector<8x1xf32>
    %32 = arith.addf %29, %31 : vector<8x1xf32>
    %c0_15 = arith.constant 0 : index
    %c1_16 = arith.constant 1 : index
    %33 = vector.load %arg4[%c0_15, %c1_16] : memref<8x4xf32, #tpu.memory_space<vmem>>, vector<8x1xf32>
    tpu.vector_store %arg4[%c0_15, %c1_16], %32 {strides = array<i32>} : memref<8x4xf32, #tpu.memory_space<vmem>>, vector<8x1xf32>,
    %c0_17 = arith.constant 0 : index
    %c2 = arith.constant 2 : index
    %34 = vector.load %arg4[%c0_17, %c2] : memref<8x4xf32, #tpu.memory_space<vmem>>, vector<8x1xf32>
    %cst_18 = arith.constant dense<0.000000e+00> : vector<8xf32>
    %35 = vector.multi_reduction <add>, %4, %cst_18 [1] : vector<8x256xf32> to vector<8xf32>
    %36 = vector.shape_cast %35 : vector<8xf32> to vector<8x1xf32>
    %37 = arith.addf %34, %36 : vector<8x1xf32>
    %c0_19 = arith.constant 0 : index
    %c2_20 = arith.constant 2 : index
    %38 = vector.load %arg4[%c0_19, %c2_20] : memref<8x4xf32, #tpu.memory_space<vmem>>, vector<8x1xf32>
    tpu.vector_store %arg4[%c0_19, %c2_20], %37 {strides = array<i32>} : memref<8x4xf32, #tpu.memory_space<vmem>>, vector<8x1xf32>,
    %c0_21 = arith.constant 0 : index
    %c3 = arith.constant 3 : index
    %39 = vector.load %arg4[%c0_21, %c3] : memref<8x4xf32, #tpu.memory_space<vmem>>, vector<8x1xf32>
    %cst_22 = arith.constant dense<0.000000e+00> : vector<8xf32>
    %40 = vector.multi_reduction <add>, %22, %cst_22 [1] : vector<8x256xf32> to vector<8xf32>
    %41 = vector.shape_cast %40 : vector<8xf32> to vector<8x1xf32>
    %42 = arith.addf %39, %41 : vector<8x1xf32>
    %c0_23 = arith.constant 0 : index
    %c3_24 = arith.constant 3 : index
    %43 = vector.load %arg4[%c0_23, %c3_24] : memref<8x4xf32, #tpu.memory_space<vmem>>, vector<8x1xf32>
    tpu.vector_store %arg4[%c0_23, %c3_24], %42 {strides = array<i32>} : memref<8x4xf32, #tpu.memory_space<vmem>>, vector<8x1xf32>,
    return
  }
  func.func @transform_0(%arg0: i32, %arg1: i32) -> (i32, i32) {
    %c0_i32 = arith.constant 0 : i32
    return %arg0, %arg1 : i32, i32
  }
  func.func @transform_1(%arg0: i32, %arg1: i32) -> (i32, i32) {
    %c0_i32 = arith.constant 0 : i32
    return %arg0, %arg1 : i32, i32
  }
  func.func @transform_2(%arg0: i32, %arg1: i32) -> (i32, i32) {
    %c0_i32 = arith.constant 0 : i32
    %c0_i32_0 = arith.constant 0 : i32
    return %arg0, %c0_i32 : i32, i32
  }
}

</mosaic_0001>

<bundles_post_ra>
// kernel: dc_and_bce_loss.1
= control target key start
LH: loop header
LB: loop body
LE: loop exit
PB: predicated region body
PF: predicated region fallthrough
CT: control target
= control target key end

     0   :  { %vm15_vm0 = vcmask 31744   ;;  %v114_v2 = vmov 0.0   ;;  %vm74_vm5 = vcmask 7168   ;;  %vm81_vm6 = vcmask 15368   ;;  %s169_s0 = inlined_call_operand.vmem [shape: f32[8,256], index: 0, kind: input, shape index: {}]   ;;  %s170_s1 = inlined_call_operand.vmem [shape: f32[8,256], index: 1, kind: input, shape index: {}]   ;;  %s171_s2 = inlined_call_operand.vmem [shape: f32[8,4], index: 2, kind: output, shape index: {}]  }
   0x1   :  { %v17_v0 = vld [vmem:[%s169_s0] sm:$0xff]  ;;  %v18_v1 = vld [vmem:[%s169_s0 + $0x8] sm:$0xff]  ;;  %16 = vst.msk [vmem:[%s171_s2] sm:$0xff] %vm15_vm0, %v114_v2  ;;  %vm88_vm7 = vcmask 23568   ;;  %vm95_vm8 = vcmask 31768  }
   0x2   :  { %v19_v3 = vld [vmem:[%s170_s1] sm:$0xff]  ;;  %v20_v4 = vld [vmem:[%s170_s1 + $0x8] sm:$0xff]  ;;  %v21_v5 = vand.u32 2147483647, %v17_v0  ;;  %v22_v6 = vand.u32 2147483647, %v18_v1 }
   0x3   :  { %v84_v7 = vadd.f32 %v20_v4, %v19_v3  ;;  %v43_v19 = vmul.f32 %v19_v3, %v17_v0  ;;  %v41_v20 = vmax.f32 %v17_v0, 0.0  ;;  %v44_v23 = vmul.f32 %v20_v4, %v18_v1 }
   0x4   :  { %v23_v8 = vsub.f32 0.0, %v21_v5  ;;  %v24_v9 = vsub.f32 0.0, %v22_v6  ;;  %v42_v24 = vmax.f32 %v18_v1, 0.0  ;;  %vm35_vm1 = vcmp.ge.f32.partialorder %v17_v0, 0.0 }
   0x5   :  { %85 = vadd.xlane.f32.xlu1 %v84_v7  ;;  %vm36_vm2 = vcmp.ge.f32.partialorder %v18_v1, 0.0  ;;  %v45_v32 = vsub.f32 %v41_v20, %v43_v19 }
   0x6   :  { %v25_v10 = vmul.f32 1.442695, %v23_v8  ;;  %v27_v11 = vmul.f32 1.442695, %v24_v9  ;;  %v46_v36 = vsub.f32 %v42_v24, %v44_v23 }
   0x8   :  { %102 = vpow2.f32 %v25_v10  ;;  %v67_v49 = vld [vmem:[%s171_s2] sm:$0xff] }
   0x9   :  { %104 = vpow2.f32 %v27_v11 }
  0x12   :  { %v103_v12 = vpop.eup %102 }
  0x13   :  { %v105_v13 = vpop.eup %104  ;;  %v29_v14 = vadd.f32 1.0, %v103_v12  ;;  %v50_v16 = vmul.f32 -0.5, %v103_v12  ;;  %v53_v21 = vand.u32 2147483647, %v103_v12 }
  0x14   :  { %v30_v15 = vadd.f32 1.0, %v105_v13  ;;  %v59_v17 = vmul.f32 -0.5, %v105_v13  ;;  %v62_v25 = vand.u32 2147483647, %v105_v13 }
  0x15   :  { %106 = vrcp.f32 %v29_v14  ;;  %v51_v18 = vadd.f32 1.0, %v50_v16  ;;  %vm54_vm3 = vcmp.lt.f32.partialorder %v53_v21, 0.0004427343 }
  0x16   :  { %108 = vrcp.f32 %v30_v15  ;;  %v60_v22 = vadd.f32 1.0, %v59_v17  ;;  %vm63_vm4 = vcmp.lt.f32.partialorder %v62_v25, 0.0004427343 }
  0x17   :  { %110 = vlog2.f32 %v29_v14  ;;  %v52_v29 = vmul.f32 %v103_v12, %v51_v18 }
  0x18   :  { %112 = vlog2.f32 %v30_v15  ;;  %v61_v33 = vmul.f32 %v105_v13, %v60_v22 }
  0x1f   :  { %v107_v26 = vpop.eup %106 }
  0x20   :  { %v109_v27 = vpop.eup %108  ;;  %v37_v28 = vmul.f32 %v107_v26, %v103_v12 }
  0x21   :  { %v111_v30 = vpop.eup %110  ;;  %v38_v31 = vmul.f32 %v109_v27, %v105_v13 }
  0x22   :  { %v113_v34 = vpop.eup %112  ;;  %v39_v35 = vsel %vm35_vm1, %v107_v26, %v37_v28  ;;  %v49_v37 = vmul.f32 0.6931472, %v111_v30 }
  0x23   :  { %v40_v38 = vsel %vm36_vm2, %v109_v27, %v38_v31  ;;  %v68_v39 = vmul.f32 %v39_v35, %v19_v3  ;;  %v58_v40 = vmul.f32 0.6931472, %v113_v34 }
  0x24   :  { %v69_v41 = vmul.f32 %v40_v38, %v20_v4  ;;  %v55_v42 = vsel %vm54_vm3, %v52_v29, %v49_v37  ;;  %v77_v47 = vadd.f32 %v40_v38, %v39_v35 }
  0x25   :  { %v64_v43 = vsel %vm63_vm4, %v61_v33, %v58_v40  ;;  %v65_v44 = vadd.f32 %v55_v42, %v45_v32 }
  0x26   :  { %v70_v45 = vadd.f32 %v69_v41, %v68_v39  ;;  %v66_v46 = vadd.f32 %v64_v43, %v46_v36 }
  0x28   :  { %71 = vadd.xlane.f32.xlu0 %v70_v45  ;;  %v91_v48 = vadd.f32 %v66_v46, %v65_v44 }
  0x2a   :  { %92 = vadd.xlane.f32.xlu1 %v91_v48 }
  0x2c   :  { %78 = vadd.xlane.f32.xlu0 %v77_v47 }
  0x92   :  { %v86_v55 = vpop.xlane.xlu1 %85 }
  0xb5   :  { %v72_v50 = vpop.xlane.xlu0 %71 }
  0xb6   :  { %v73_v51 = vadd.f32 %v72_v50, %v67_v49 }
  0xb7   :  { %v93_v58 = vpop.xlane.xlu1 %92 }
  0xb8   :  { %75 = vst.msk [vmem:[%s171_s2] sm:$0xff] %vm74_vm5, %v73_v51 }
  0xb9   :  { %v79_v52 = vpop.xlane.xlu0 %78 }
  0xbf   :  { %v76_v53 = vld [vmem:[%s171_s2] sm:$0xff] }
  0xc0   :  { %v80_v54 = vadd.f32 %v79_v52, %v76_v53 }
  0xc2   :  { %82 = vst.msk [vmem:[%s171_s2] sm:$0xff] %vm81_vm6, %v80_v54 }
  0xc9   :  { %v83_v56 = vld [vmem:[%s171_s2] sm:$0xff] }
  0xca   :  { %v87_v57 = vadd.f32 %v86_v55, %v83_v56 }
  0xcc   :  { %89 = vst.msk [vmem:[%s171_s2] sm:$0xff] %vm88_vm7, %v87_v57 }
  0xd3   :  { %v90_v59 = vld [vmem:[%s171_s2] sm:$0xff] }
  0xd4   :  { %v94_v60 = vadd.f32 %v93_v58, %v90_v59 }
  0xd6   :  { %96 = vst.msk [vmem:[%s171_s2] sm:$0xff] %vm95_vm8, %v94_v60 }

</bundles_post_ra>
